<compile_context>
chip_gen: v5e
topology: v5e:2x2
jax: 0.10.0
libtpu: 0.0.40
codegen_flags: <defaults>
</compile_context>

<pallas_src>
import jax
import jax.numpy as jnp
from jax import lax
from jax.experimental import pallas as pl
from jax.experimental.pallas import tpu as pltpu

PATCH = 14
EPS = 1e-5  # PyTorch LayerNorm default


def _full_spec(shape):
    n = len(shape)
    return pl.BlockSpec(shape, lambda i, _n=n: (0,) * _n)


# ---------------- Pallas kernels ----------------

def patch_embed_kernel(p_ref, w_ref, b_ref, o_ref):
    # p_ref: (tm, K) bf16   w_ref: (K, E) bf16   b_ref: (1, E) f32   o_ref: (tm, E) bf16
    acc = jnp.dot(p_ref[...], w_ref[...], preferred_element_type=jnp.float32)
    o_ref[...] = (acc + b_ref[...]).astype(o_ref.dtype)


def head_kernel(f_ref, aff_ref, w1_ref, b1_ref, w2_ref, b2w3_ref, b3_ref, o_ref):
    # f_ref: (1, E) = cls_token + pos_embed[:, 0]  (exact: LayerNorm is per-token)
    f = f_ref[...]
    aff = aff_ref[...]                      # (4, E): bn_w, bn_b, ln_w, ln_b
    b2w3 = b2w3_ref[...]                    # (2, 128): b2, w3

    # backbone LayerNorm (over embed dim)
    mu = jnp.mean(f, axis=-1, keepdims=True)
    var = jnp.mean((f - mu) ** 2, axis=-1, keepdims=True)
    f = (f - mu) * lax.rsqrt(var + EPS) * aff[0:1, :] + aff[1:2, :]

    # regression-head LayerNorm
    mu2 = jnp.mean(f, axis=-1, keepdims=True)
    var2 = jnp.mean((f - mu2) ** 2, axis=-1, keepdims=True)
    f = (f - mu2) * lax.rsqrt(var2 + EPS) * aff[2:3, :] + aff[3:4, :]

    # MLP head (tiny; f32 for bit-comparability; Dropout = identity in eval mode)
    h = jnp.maximum(
        jnp.dot(f, w1_ref[...], preferred_element_type=jnp.float32) + b1_ref[...], 0.0)
    h = jnp.maximum(
        jnp.dot(h, w2_ref[...], preferred_element_type=jnp.float32) + b2w3[0:1, :], 0.0)

    # final 128 -> 1 projection as VPU multiply + lane reduction (no N=1 MXU matmul)
    o_ref[...] = jnp.sum(h * b2w3[1:2, :], axis=-1, keepdims=True) + b3_ref[...]


# ---------------- parameter preparation (one-time, outside hot path) ----------------

def prepare_params(params):
    E = params["conv_w"].shape[0]
    K = params["conv_w"].size // E                          # 3 * 14 * 14 = 588
    return {
        # conv as matmul: (K, E) bf16, no explicit K pad (Mosaic pads lanes internally)
        "w_flat_bf16": params["conv_w"].reshape(E, K).T.astype(jnp.bfloat16),
        "conv_b": params["conv_b"].reshape(1, E).astype(jnp.float32),
        "k": K,
        # head operands, packed
        "feat0": (params["cls_token"][:, 0, :]
                  + params["pos_embed"][:, 0, :]).astype(jnp.float32),      # (1, E)
        "affine": jnp.stack([params["bn_w"], params["bn_b"],
                             params["ln_w"], params["ln_b"]], axis=0),      # (4, E)
        "w1": params["w1"].T,                                               # (E, 256)
        "b1": params["b1"].reshape(1, -1),                                  # (1, 256)
        "w2": params["w2"].T,                                               # (256, 128)
        "b2w3": jnp.stack([params["b2"], params["w3"][0]], axis=0),         # (2, 128)
        "b3": params["b3"].reshape(1, 1),                                   # (1, 1)
    }


# ---------------- patch-embed forward (tiled, pipelined, bf16 out) ----------------

def patch_embed_forward(x, prepared, *, tm=512):
    B, C, H, W = x.shape
    Ph, Pw = H // PATCH, W // PATCH
    NP = Ph * Pw
    K = prepared["k"]
    E = prepared["w_flat_bf16"].shape[1]
    M = B * NP

    # single-pass im2col: cast to bf16 first so the (M, K) intermediate is written once
    patches = (x.astype(jnp.bfloat16)
                 .reshape(B, C, Ph, PATCH, Pw, PATCH)
                 .transpose(0, 2, 4, 1, 3, 5)
                 .reshape(M, K))

    # M tile: sublane-aligned, as large as requested, but keep >= 2 grid steps when
    # possible so v7x's second TensorCore gets work (v5e/v6e unaffected).
    tm = max(8, min(tm, M))
    tm = (tm // 8) * 8
    if M > 8 and pl.cdiv(M, tm) < 2:
        tm = max(8, ((M // 2) // 8) * 8)
    Mp = pl.cdiv(M, tm) * tm
    if Mp != M:
        patches = jnp.pad(patches, ((0, Mp - M), (0, 0)))

    out = pl.pallas_call(
        patch_embed_kernel,
        grid=(Mp // tm,),
        in_specs=[
            pl.BlockSpec((tm, K), lambda i: (i, 0)),     # patches tile (bf16)
            pl.BlockSpec((K, E), lambda i: (0, 0)),      # weights, resident (bf16)
            pl.BlockSpec((1, E), lambda i: (0, 0)),      # bias, resident (f32)
        ],
        out_specs=pl.BlockSpec((tm, E), lambda i: (i, 0)),
        out_shape=jax.ShapeDtypeStruct((Mp, E), jnp.bfloat16),   # bf16 writeback
        compiler_params=pltpu.CompilerParams(
            dimension_semantics=("parallel",)),          # shards M across TCs on v7x
    )(patches, prepared["w_flat_bf16"], prepared["conv_b"])

    if Mp != M:
        out = out[:M]
    return out.reshape(B, NP, E)


# ---------------- full forward ----------------

def dinov2_regression_forward(x, params, prepared=None, *, tm=512,
                              with_patch_tokens=False):
    if prepared is None:
        prepared = prepare_params(params)
    B = x.shape[0]

    args = [
        prepared["feat0"],                 # (1, E) -- batch-independent cls row
        prepared["affine"],                # (4, E)
        prepared["w1"], prepared["b1"],
        prepared["w2"], prepared["b2w3"],
        prepared["b3"],
    ]
    out = pl.pallas_call(
        head_kernel,
        grid=(1,),
        in_specs=[_full_spec(a.shape) for a in args],
        out_specs=_full_spec((1, 1)),
        out_shape=jax.ShapeDtypeStruct((1, 1), jnp.float32),
    )(*args)
    count = jnp.broadcast_to(out[:, 0], (B,))            # count.squeeze(-1) -> (B,)

    if with_patch_tokens:
        return count, patch_embed_forward(x, prepared, tm=tm)
    return count


# ---------------- pure-JAX references (sanity checks) ----------------

def reference_forward(x, params):
    """Full PyTorch-equivalent path (conv -> concat -> +pos -> LN -> cls -> head)."""
    B, C, H, W = x.shape
    Ph, Pw = H // PATCH, W // PATCH
    NP = Ph * Pw
    E = params["conv_w"].shape[0]
    patches = (x.reshape(B, C, Ph, PATCH, Pw, PATCH)
                 .transpose(0, 2, 4, 1, 3, 5)
                 .reshape(B * NP, C * PATCH * PATCH))
    pt = patches @ params["conv_w"].reshape(E, -1).T + params["conv_b"]
    tok = jnp.concatenate(
        [jnp.broadcast_to(params["cls_token"], (B, 1, E)), pt.reshape(B, NP, E)], 1)
    tok = tok + params["pos_embed"]

    def ln(v, w, b):
        mu = v.mean(-1, keepdims=True)
        var = ((v - mu) ** 2).mean(-1, keepdims=True)
        return (v - mu) / jnp.sqrt(var + EPS) * w + b

    feat = ln(tok, params["bn_w"], params["bn_b"])[:, 0, :]
    h = ln(feat, params["ln_w"], params["ln_b"])
    h = jnp.maximum(h @ params["w1"].T + params["b1"], 0.0)
    h = jnp.maximum(h @ params["w2"].T + params["b2"], 0.0)
    return (h @ params["w3"].T + params["b3"])[:, 0]


def reference_patch_tokens(x, params):
    """Patch-embed conv reference with the same bf16 operand cast / f32 accumulate."""
    B, C, H, W = x.shape
    Ph, Pw = H // PATCH, W // PATCH
    NP = Ph * Pw
    E = params["conv_w"].shape[0]
    patches = (x.reshape(B, C, Ph, PATCH, Pw, PATCH)
                 .transpose(0, 2, 4, 1, 3, 5)
                 .reshape(B * NP, C * PATCH * PATCH)).astype(jnp.bfloat16)
    w_flat = params["conv_w"].reshape(E, -1).T.astype(jnp.bfloat16)
    out = jnp.dot(patches, w_flat, preferred_element_type=jnp.float32) + params["conv_b"]
    return out.reshape(B, NP, E)


# ---------------- parameter init (deterministic, synthetic) ----------------

def init_params(key, embed_dim=384, num_patches=64):
    ks = jax.random.split(key, 14)
    E = embed_dim
    return {
        "conv_w": jax.random.normal(ks[0], (E, 3, PATCH, PATCH), jnp.float32) * 0.02,
        "conv_b": jax.random.normal(ks[1], (E,), jnp.float32) * 0.02,
        "pos_embed": jax.random.normal(ks[2], (1, num_patches + 1, E), jnp.float32) * 0.02,
        "cls_token": jax.random.normal(ks[3], (1, 1, E), jnp.float32) * 0.02,
        "bn_w": 1.0 + 0.05 * jax.random.normal(ks[4], (E,), jnp.float32),
        "bn_b": 0.05 * jax.random.normal(ks[5], (E,), jnp.float32),
        "ln_w": 1.0 + 0.05 * jax.random.normal(ks[6], (E,), jnp.float32),
        "ln_b": 0.05 * jax.random.normal(ks[7], (E,), jnp.float32),
        "w1": jax.random.normal(ks[8], (256, E), jnp.float32) * 0.01,
        "b1": 0.01 * jax.random.normal(ks[9], (256,), jnp.float32),
        "w2": jax.random.normal(ks[10], (128, 256), jnp.float32) * 0.01,
        "b2": 0.01 * jax.random.normal(ks[11], (128,), jnp.float32),
        "w3": jax.random.normal(ks[12], (1, 128), jnp.float32) * 0.01,
        "b3": 0.01 * jax.random.normal(ks[13], (1,), jnp.float32),
    }


if __name__ == "__main__":
    # small shapes consistent with the module: 3-channel image, side divisible by 14
    B, C, H, W = 2, 3, 112, 112            # -> 8x8 = 64 patches, M = B*NP = 128
    E = 384                                # 'small' DINOv2 embed dim
    NP = (H // PATCH) * (W // PATCH)

    key = jax.random.PRNGKey(0)
    kp, kx = jax.random.split(key)
    params = init_params(kp, embed_dim=E, num_patches=NP)
    prepared = prepare_params(params)
    x = jax.random.normal(kx, (B, C, H, W), jnp.float32)

    count, patch_tok = dinov2_regression_forward(
        x, params, prepared, with_patch_tokens=True)   # tm auto-clamps -> 2-step grid
    count = jax.block_until_ready(count)
    patch_tok = jax.block_until_ready(patch_tok)

    # regression output (exactly matches the full PyTorch-equivalent path)
    ref_count = reference_forward(x, params)
    assert count.shape == (B,), count.shape
    assert jnp.allclose(count, ref_count, atol=1e-4, rtol=1e-3), (count, ref_count)

    # patch-embed (conv) output: bf16 kernel output vs bf16-operand f32-accum reference
    ref_pt = reference_patch_tokens(x, params)
    assert patch_tok.shape == (B, NP, E), patch_tok.shape
    assert patch_tok.dtype == jnp.bfloat16, patch_tok.dtype
    assert jnp.allclose(patch_tok.astype(jnp.float32), ref_pt, atol=1e-2, rtol=1e-2)

    print("KERNEL_OK")
</pallas_src>

<mosaic_0001>
module attributes {stable_mosaic.version = 11 : i64} {
  func.func @head_kernel(%arg0: i32, %arg1: memref<1x384xf32, #tpu.memory_space<vmem>>, %arg2: memref<4x384xf32, #tpu.memory_space<vmem>>, %arg3: memref<384x256xf32, #tpu.memory_space<vmem>>, %arg4: memref<1x256xf32, #tpu.memory_space<vmem>>, %arg5: memref<256x128xf32, #tpu.memory_space<vmem>>, %arg6: memref<2x128xf32, #tpu.memory_space<vmem>>, %arg7: memref<1x1xf32, #tpu.memory_space<vmem>>, %arg8: memref<1x1xf32, #tpu.memory_space<vmem>>) attributes {dimension_semantics = [#tpu.dimension_semantics<arbitrary>], iteration_bounds = array<i64: 1>, scalar_prefetch = 0 : i64, scratch_operands = 0 : i64, tpu.core_type = #tpu.core_type<tc>, window_params = [{pipeline_mode = #tpu.pipeline_mode<synchronous>, transform_indices = @transform_0, window_bounds = array<i64: 1, 384>}, {pipeline_mode = #tpu.pipeline_mode<synchronous>, transform_indices = @transform_1, window_bounds = array<i64: 4, 384>}, {pipeline_mode = #tpu.pipeline_mode<synchronous>, transform_indices = @transform_2, window_bounds = array<i64: 384, 256>}, {pipeline_mode = #tpu.pipeline_mode<synchronous>, transform_indices = @transform_3, window_bounds = array<i64: 1, 256>}, {pipeline_mode = #tpu.pipeline_mode<synchronous>, transform_indices = @transform_4, window_bounds = array<i64: 256, 128>}, {pipeline_mode = #tpu.pipeline_mode<synchronous>, transform_indices = @transform_5, window_bounds = array<i64: 2, 128>}, {pipeline_mode = #tpu.pipeline_mode<synchronous>, transform_indices = @transform_6, window_bounds = array<i64: 1, 1>}, {pipeline_mode = #tpu.pipeline_mode<synchronous>, transform_indices = @transform_7, window_bounds = array<i64: 1, 1>}]} {
    %c0 = arith.constant 0 : index
    %c0_0 = arith.constant 0 : index
    %0 = vector.load %arg1[%c0, %c0_0] : memref<1x384xf32, #tpu.memory_space<vmem>>, vector<1x384xf32>
    %c0_1 = arith.constant 0 : index
    %c0_2 = arith.constant 0 : index
    %1 = vector.load %arg2[%c0_1, %c0_2] : memref<4x384xf32, #tpu.memory_space<vmem>>, vector<4x384xf32>
    %c0_3 = arith.constant 0 : index
    %c0_4 = arith.constant 0 : index
    %2 = vector.load %arg6[%c0_3, %c0_4] : memref<2x128xf32, #tpu.memory_space<vmem>>, vector<2x128xf32>
    %cst = arith.constant dense<0.000000e+00> : vector<1xf32>
    %3 = vector.multi_reduction <add>, %0, %cst [1] : vector<1x384xf32> to vector<1xf32>
    %4 = vector.shape_cast %3 : vector<1xf32> to vector<1x1xf32>
    %cst_5 = arith.constant 3.840000e+02 : f32
    %5 = vector.broadcast %cst_5 : f32 to vector<1x1xf32>
    %6 = arith.divf %4, %5 : vector<1x1xf32>
    %7 = vector.broadcast %6 : vector<1x1xf32> to vector<1x384xf32>
    %8 = arith.subf %0, %7 : vector<1x384xf32>
    %9 = arith.mulf %8, %8 : vector<1x384xf32>
    %cst_6 = arith.constant dense<0.000000e+00> : vector<1xf32>
    %10 = vector.multi_reduction <add>, %9, %cst_6 [1] : vector<1x384xf32> to vector<1xf32>
    %11 = vector.shape_cast %10 : vector<1xf32> to vector<1x1xf32>
    %cst_7 = arith.constant 3.840000e+02 : f32
    %12 = vector.broadcast %cst_7 : f32 to vector<1x1xf32>
    %13 = arith.divf %11, %12 : vector<1x1xf32>
    %14 = vector.broadcast %6 : vector<1x1xf32> to vector<1x384xf32>
    %15 = arith.subf %0, %14 : vector<1x384xf32>
    %cst_8 = arith.constant 9.99999974E-6 : f32
    %16 = vector.broadcast %cst_8 : f32 to vector<1x1xf32>
    %17 = arith.addf %13, %16 : vector<1x1xf32>
    %18 = math.rsqrt %17 : vector<1x1xf32>
    %19 = vector.broadcast %18 : vector<1x1xf32> to vector<1x384xf32>
    %20 = arith.mulf %15, %19 : vector<1x384xf32>
    %21 = vector.extract_strided_slice %1 {offsets = [0, 0], sizes = [1, 384], strides = [1, 1]} : vector<4x384xf32> to vector<1x384xf32>
    %22 = arith.mulf %20, %21 : vector<1x384xf32>
    %23 = vector.extract_strided_slice %1 {offsets = [1, 0], sizes = [1, 384], strides = [1, 1]} : vector<4x384xf32> to vector<1x384xf32>
    %24 = arith.addf %22, %23 : vector<1x384xf32>
    %cst_9 = arith.constant dense<0.000000e+00> : vector<1xf32>
    %25 = vector.multi_reduction <add>, %24, %cst_9 [1] : vector<1x384xf32> to vector<1xf32>
    %26 = vector.shape_cast %25 : vector<1xf32> to vector<1x1xf32>
    %cst_10 = arith.constant 3.840000e+02 : f32
    %27 = vector.broadcast %cst_10 : f32 to vector<1x1xf32>
    %28 = arith.divf %26, %27 : vector<1x1xf32>
    %29 = vector.broadcast %28 : vector<1x1xf32> to vector<1x384xf32>
    %30 = arith.subf %24, %29 : vector<1x384xf32>
    %31 = arith.mulf %30, %30 : vector<1x384xf32>
    %cst_11 = arith.constant dense<0.000000e+00> : vector<1xf32>
    %32 = vector.multi_reduction <add>, %31, %cst_11 [1] : vector<1x384xf32> to vector<1xf32>
    %33 = vector.shape_cast %32 : vector<1xf32> to vector<1x1xf32>
    %cst_12 = arith.constant 3.840000e+02 : f32
    %34 = vector.broadcast %cst_12 : f32 to vector<1x1xf32>
    %35 = arith.divf %33, %34 : vector<1x1xf32>
    %36 = vector.broadcast %28 : vector<1x1xf32> to vector<1x384xf32>
    %37 = arith.subf %24, %36 : vector<1x384xf32>
    %cst_13 = arith.constant 9.99999974E-6 : f32
    %38 = vector.broadcast %cst_13 : f32 to vector<1x1xf32>
    %39 = arith.addf %35, %38 : vector<1x1xf32>
    %40 = math.rsqrt %39 : vector<1x1xf32>
    %41 = vector.broadcast %40 : vector<1x1xf32> to vector<1x384xf32>
    %42 = arith.mulf %37, %41 : vector<1x384xf32>
    %43 = vector.extract_strided_slice %1 {offsets = [2, 0], sizes = [1, 384], strides = [1, 1]} : vector<4x384xf32> to vector<1x384xf32>
    %44 = arith.mulf %42, %43 : vector<1x384xf32>
    %45 = vector.extract_strided_slice %1 {offsets = [3, 0], sizes = [1, 384], strides = [1, 1]} : vector<4x384xf32> to vector<1x384xf32>
    %46 = arith.addf %44, %45 : vector<1x384xf32>
    %c0_14 = arith.constant 0 : index
    %c0_15 = arith.constant 0 : index
    %47 = vector.load %arg3[%c0_14, %c0_15] : memref<384x256xf32, #tpu.memory_space<vmem>>, vector<384x256xf32>
    %cst_16 = arith.constant dense<0.000000e+00> : vector<1x256xf32>
    %48 = tpu.matmul %46, %47, %cst_16 {dimension_numbers = #tpu.dot_dimension_numbers<[1], [0], [0], [1], [0, 0, 1, 1], [], []>} : vector<1x384xf32>, vector<384x256xf32>, vector<1x256xf32> -> vector<1x256xf32>
    %c0_17 = arith.constant 0 : index
    %c0_18 = arith.constant 0 : index
    %49 = vector.load %arg4[%c0_17, %c0_18] : memref<1x256xf32, #tpu.memory_space<vmem>>, vector<1x256xf32>
    %50 = arith.addf %48, %49 : vector<1x256xf32>
    %cst_19 = arith.constant 0.000000e+00 : f32
    %51 = vector.broadcast %cst_19 : f32 to vector<1x256xf32>
    %52 = arith.maximumf %50, %51 : vector<1x256xf32>
    %c0_20 = arith.constant 0 : index
    %c0_21 = arith.constant 0 : index
    %53 = vector.load %arg5[%c0_20, %c0_21] : memref<256x128xf32, #tpu.memory_space<vmem>>, vector<256x128xf32>
    %cst_22 = arith.constant dense<0.000000e+00> : vector<1x128xf32>
    %54 = tpu.matmul %52, %53, %cst_22 {dimension_numbers = #tpu.dot_dimension_numbers<[1], [0], [0], [1], [0, 0, 1, 1], [], []>} : vector<1x256xf32>, vector<256x128xf32>, vector<1x128xf32> -> vector<1x128xf32>
    %55 = vector.extract_strided_slice %2 {offsets = [0, 0], sizes = [1, 128], strides = [1, 1]} : vector<2x128xf32> to vector<1x128xf32>
    %56 = arith.addf %54, %55 : vector<1x128xf32>
    %cst_23 = arith.constant 0.000000e+00 : f32
    %57 = vector.broadcast %cst_23 : f32 to vector<1x128xf32>
    %58 = arith.maximumf %56, %57 : vector<1x128xf32>
    %59 = vector.extract_strided_slice %2 {offsets = [1, 0], sizes = [1, 128], strides = [1, 1]} : vector<2x128xf32> to vector<1x128xf32>
    %60 = arith.mulf %58, %59 : vector<1x128xf32>
    %cst_24 = arith.constant dense<0.000000e+00> : vector<1xf32>
    %61 = vector.multi_reduction <add>, %60, %cst_24 [1] : vector<1x128xf32> to vector<1xf32>
    %62 = vector.shape_cast %61 : vector<1xf32> to vector<1x1xf32>
    %c0_25 = arith.constant 0 : index
    %c0_26 = arith.constant 0 : index
    %63 = vector.load %arg7[%c0_25, %c0_26] : memref<1x1xf32, #tpu.memory_space<vmem>>, vector<1x1xf32>
    %64 = arith.addf %62, %63 : vector<1x1xf32>
    %c0_27 = arith.constant 0 : index
    %c0_28 = arith.constant 0 : index
    %65 = vector.load %arg8[%c0_27, %c0_28] : memref<1x1xf32, #tpu.memory_space<vmem>>, vector<1x1xf32>
    tpu.vector_store %arg8[%c0_27, %c0_28], %64 {strides = array<i32>} : memref<1x1xf32, #tpu.memory_space<vmem>>, vector<1x1xf32>,
    return
  }
  func.func @transform_0(%arg0: i32) -> (i32, i32) {
    %c0_i32 = arith.constant 0 : i32
    %c0_i32_0 = arith.constant 0 : i32
    %c0_i32_1 = arith.constant 0 : i32
    return %c0_i32, %c0_i32_0 : i32, i32
  }
  func.func @transform_1(%arg0: i32) -> (i32, i32) {
    %c0_i32 = arith.constant 0 : i32
    %c0_i32_0 = arith.constant 0 : i32
    %c0_i32_1 = arith.constant 0 : i32
    return %c0_i32, %c0_i32_0 : i32, i32
  }
  func.func @transform_2(%arg0: i32) -> (i32, i32) {
    %c0_i32 = arith.constant 0 : i32
    %c0_i32_0 = arith.constant 0 : i32
    %c0_i32_1 = arith.constant 0 : i32
    return %c0_i32, %c0_i32_0 : i32, i32
  }
  func.func @transform_3(%arg0: i32) -> (i32, i32) {
    %c0_i32 = arith.constant 0 : i32
    %c0_i32_0 = arith.constant 0 : i32
    %c0_i32_1 = arith.constant 0 : i32
    return %c0_i32, %c0_i32_0 : i32, i32
  }
  func.func @transform_4(%arg0: i32) -> (i32, i32) {
    %c0_i32 = arith.constant 0 : i32
    %c0_i32_0 = arith.constant 0 : i32
    %c0_i32_1 = arith.constant 0 : i32
    return %c0_i32, %c0_i32_0 : i32, i32
  }
  func.func @transform_5(%arg0: i32) -> (i32, i32) {
    %c0_i32 = arith.constant 0 : i32
    %c0_i32_0 = arith.constant 0 : i32
    %c0_i32_1 = arith.constant 0 : i32
    return %c0_i32, %c0_i32_0 : i32, i32
  }
  func.func @transform_6(%arg0: i32) -> (i32, i32) {
    %c0_i32 = arith.constant 0 : i32
    %c0_i32_0 = arith.constant 0 : i32
    %c0_i32_1 = arith.constant 0 : i32
    return %c0_i32, %c0_i32_0 : i32, i32
  }
  func.func @transform_7(%arg0: i32) -> (i32, i32) {
    %c0_i32 = arith.constant 0 : i32
    %c0_i32_0 = arith.constant 0 : i32
    %c0_i32_1 = arith.constant 0 : i32
    return %c0_i32, %c0_i32_0 : i32, i32
  }
}

</mosaic_0001>

<bundles_post_ra>
// kernel: tpu_custom_call.1
= control target key start
LH: loop header
LB: loop body
LE: loop exit
PB: predicated region body
PF: predicated region fallthrough
CT: control target
= control target key end

     0   :  { %s824_s0 = inlined_call_operand.hbm [shape: f32[1,384], index: 0, kind: input, shape index: {}]   ;;  %s825_s1 = inlined_call_operand.hbm [shape: f32[4,384], index: 1, kind: input, shape index: {}]   ;;  %s826_s2 = inlined_call_operand.hbm [shape: f32[384,256], index: 2, kind: input, shape index: {}]   ;;  %s827_s3 = inlined_call_operand.vmem [shape: f32[1,256], index: 3, kind: input, shape index: {}]   ;;  %s828_s4 = inlined_call_operand.hbm [shape: f32[256,128], index: 4, kind: input, shape index: {}]   ;;  %s829_s5 = inlined_call_operand.vmem [shape: f32[2,128], index: 5, kind: input, shape index: {}]   ;;  %s830_s6 = inlined_call_operand.<no memory space> [shape: f32[1,1], index: 6, kind: input, shape index: {}]   ;;  %s831_s7 = inlined_call_operand.hbm [shape: f32[1,1], index: 7, kind: output, shape index: {}]  }
   0x1   :  { %v12_v0 = vstv %s830_s6 }
   0x2   :  { %13 = vst [vmem:[#allocation2] sm:$0x1] %v12_v0 }
   0x3   :  { %14 = vsyncpa [#allocation4], 0 }
   0x4   :  { %15 = vsyncpa [#allocation7], 0 }
   0x5   :  { %16 = vsyncpa [#allocation10], 0  ;;  %s34_s28 = sshll.u32 %s825_s1, 4  ;;  %s35_s28 = int_to_ptr.hbm [resolvable:$true] %s34_s28 }
   0x6   :  { %17 = vsyncpa [#allocation5], 0  ;;  %s708_s29 = smov [#allocation6]   ;;  %s23_s10 = sshll.u32 %s824_s0, 4  ;;  %s24_s10 = int_to_ptr.hbm [resolvable:$true] %s23_s10 }
   0x7   :  { %s36_s30 = sshll.u32 %s708_s29, 4  ;;  %s709_s6 = smov [#allocation3]   ;;  %s37_s30 = int_to_ptr.vmem [resolvable:$true] %s36_s30 }
   0x8   :  { %39 = dma.hbm_to_vmem [thread:$0]  %s35_s28, 192, %s37_s30, [#allocation7]  }
   0x9   :  { %s25_s11 = sshll.u32 %s709_s6, 4  ;;  %s44_s14 = sshll.u32 %s826_s2, 4  ;;  %s26_s11 = int_to_ptr.vmem [resolvable:$true] %s25_s11  ;;  %s45_s14 = int_to_ptr.hbm [resolvable:$true] %s44_s14 }
   0xa   :  { %28 = dma.hbm_to_vmem [thread:$0]  %s24_s10, 48, %s26_s11, [#allocation4]  }
   0xb   :  { %s710_s1 = smov [#allocation8]   ;;  %s59_s18 = sshll.u32 %s828_s4, 4  ;;  %s60_s18 = int_to_ptr.hbm [resolvable:$true] %s59_s18 }
   0xc   :  { %s46_s15 = sshll.u32 %s710_s1, 4  ;;  %s711_s19 = smov 256   ;;  %s47_s15 = int_to_ptr.vmem [resolvable:$true] %s46_s15 }
   0xd   :  { %s712_s0 = smov 16   ;;  %s713_s20 = smov [#allocation9]  }
   0xe   :  { %52 = dma.hbm_to_vmem [thread:$0]  %s45_s14, 12288, %s47_s15, [#allocation7], %s711_s19, %s711_s19, %s712_s0  }
   0xf   :  { %s61_s21 = sshll.u32 %s713_s20, 4  ;;  %s714_s22 = smov 128   ;;  %s62_s21 = int_to_ptr.vmem [resolvable:$true] %s61_s21 }
  0x10   :  { %s715_s23 = smov 8  }
  0x11   :  { %67 = dma.hbm_to_vmem [thread:$0]  %s60_s18, 4096, %s62_s21, [#allocation10], %s714_s22, %s714_s22, %s715_s23  }
  0x12   :  { %700 = dma.done.wait [#allocation4], 48  }
  0x13   :  { %701 = vsyncadd [#allocation4], 4294967248 }
  0x14   :  { %702 = dma.done.wait [#allocation7], 12480  }
  0x15   :  { %703 = vsyncadd [#allocation7], 4294954816 }
  0x16   :  { %704 = dma.done.wait [#allocation10], 4096  }
  0x17   :  { %705 = vsyncadd [#allocation10], 4294963200  ;;  %v88_v1 = vld [vmem:[#allocation3] sm:$0x7]  ;;  %vm99_vm0 = vcmask 1040384   ;;  %v716_v10 = vmov 384.0  }
  0x18   :  { %v93_v2 = vperm.slane %v88_v1, 0  ;;  %v94_v3 = vperm.slane %v88_v1, 1  ;;  %v95_v4 = vperm.slane %v88_v1, 2  ;;  %574 = vrcp.f32 %v716_v10  ;;  %v782_v30 = vld [vmem:[#allocation6] sm:$0xff]  ;;  %v784_v31 = vld [vmem:[#allocation6 + $0x8] sm:$0xf] }
  0x19   :  { %162 = vst [vmem:[#allocation1] sm:$0xff] %v782_v30  ;;  %v152_v40 = vrot.slane %v782_v30, 3  ;;  %v153_v41 = vrot.slane %v784_v31, 6  ;;  %v154_v42 = vrot.slane %v784_v31, 1  ;;  %vm156_vm3 = vcmask 1042434   ;;  %v260_v61 = vld [vmem:[#allocation8 + $0xf0] sm:$0xff] }
  0x1a   :  { %v100_v5 = vsel %vm99_vm0, %v93_v2, 0.0  ;;  %v101_v6 = vsel %vm99_vm0, %v94_v3, 0.0  ;;  %v103_v7 = vsel %vm99_vm0, %v95_v4, 0.0  ;;  %163 = vst [vmem:[#allocation1 + $0x8] sm:$0xff] %v784_v31  ;;  %vm158_vm6 = vcmask 1041408   ;;  %v292_v62 = vld [vmem:[#allocation8 + $0x1f0] sm:$0xff]  ;;  %339 = vmatpush.msra.mxu0 %v260_v61 }
  0x1b   :  { %v102_v8 = vadd.f32 %v101_v6, %v100_v5  ;;  %v155_v45 = vsel %vm99_vm0, %v782_v30, %v152_v40  ;;  %v157_v46 = vsel %vm156_vm3, %v153_v41, %v154_v42  ;;  %v258_v63 = vld [vmem:[#allocation8 + $0xe0] sm:$0xff]  ;;  %359 = vmatpush.msra.mxu1 %v292_v62  ;;  %v288_v2 = vld [vmem:[#allocation8 + $0x1d0] sm:$0xff]  ;;  %v259_v42 = vld [vmem:[#allocation8 + $0xe8] sm:$0xff]  ;;  %s717_s25 = smov [#allocation11]   ;;  %s552_s29 = sshll.u32 %s831_s7, 4  ;;  %vm543_vm10 = vcmask 0   ;;  %s553_s29 = int_to_ptr.hbm [resolvable:$true] %s552_s29 }
  0x1c   :  { %v159_v49 = vsel %vm158_vm6, %v155_v45, %v157_v46  ;;  %v290_v0 = vld [vmem:[#allocation8 + $0x1e0] sm:$0xff]  ;;  %340 = vmatpush.msra.mxu0 %v258_v63  ;;  %v252_v5 = vld [vmem:[#allocation8 + $0xb0] sm:$0xff]  ;;  %v257_v46 = vld [vmem:[#allocation8 + $0xd8] sm:$0xff]  ;;  %s550_s26 = sshll.u32 %s717_s25, 4  ;;  %s551_s26 = int_to_ptr.vmem [resolvable:$true] %s550_s26 }
  0x1d   :  { %v104_v9 = vadd.f32 %v103_v7, %v102_v8  ;;  %360 = vmatpush.msra.mxu1 %v290_v0  ;;  %v254_v3 = vld [vmem:[#allocation8 + $0xc0] sm:$0xff]  ;;  %v284_v6 = vld [vmem:[#allocation8 + $0x1b0] sm:$0xff]  ;;  %v249_v62 = vld [vmem:[#allocation8 + $0x98] sm:$0xff] }
  0x1e   :  { %v575_v11 = vpop.eup %574  ;;  %v286_v4 = vld [vmem:[#allocation8 + $0x1c0] sm:$0xff]  ;;  %v280_v10 = vld [vmem:[#allocation8 + $0x190] sm:$0xff]  ;;  %v289_v63 = vld [vmem:[#allocation8 + $0x1d8] sm:$0xff] }
  0x1f   :  { %105 = vadd.xlane.f32.xlu0 %v104_v9  ;;  %v108_v12 = vmul.f32 384.0, %v575_v11  ;;  %vm112_vm1 = vweird.f32 %v575_v11  ;;  %361 = vmatpush.msra.mxu1 %v288_v2  ;;  %v250_v7 = vld [vmem:[#allocation8 + $0xa0] sm:$0xff]  ;;  %v248_v9 = vld [vmem:[#allocation8 + $0x90] sm:$0xff]  ;;  %v321_v0 = vld [vmem:[#allocation8 + $0x2d8] sm:$0xff] }
  0x20   :  { %v282_v8 = vld [vmem:[#allocation8 + $0x1a0] sm:$0xff]  ;;  %v268_v40 = vld [vmem:[#allocation8 + $0x130] sm:$0xff]  ;;  %v247_v2 = vld [vmem:[#allocation8 + $0x88] sm:$0xff] }
  0x21   :  { %v109_v13 = vsub.f32 1.0, %v108_v12  ;;  %v165_v32 = vld [vmem:[#allocation1 + $0x1] ss:$4 sm:$0xff]  ;;  %362 = vmatpush.msra.mxu1 %v286_v4 }
  0x22   :  { %218 = vst [vmem:[#allocation1] sm:$0xff] %v782_v30  ;;  %v278_v12 = vld [vmem:[#allocation8 + $0x180] sm:$0xff]  ;;  %v320_v45 = vld [vmem:[#allocation8 + $0x2d0] sm:$0xff]  ;;  %v319_v4 = vld [vmem:[#allocation8 + $0x2c8] sm:$0xff] }
  0x23   :  { %v110_v14 = vmul.f32 %v575_v11, %v109_v13  ;;  %219 = vst [vmem:[#allocation1 + $0x8] sm:$0xff] %v784_v31  ;;  %363 = vmatpush.msra.mxu1 %v284_v6  ;;  %v244_v13 = vld [vmem:[#allocation8 + $0x70] sm:$0xff]  ;;  %v322_v41 = vld [vmem:[#allocation8 + $0x2e0] sm:$0xff]  ;;  %v245_v6 = vld [vmem:[#allocation8 + $0x78] sm:$0xff] }
  0x24   :  { %v312_v61 = vld [vmem:[#allocation8 + $0x290] sm:$0xff] }
  0x25   :  { %v111_v15 = vadd.f32 %v575_v11, %v110_v14  ;;  %364 = vmatpush.msra.mxu1 %v282_v8  ;;  %v276_v14 = vld [vmem:[#allocation8 + $0x170] sm:$0xff]  ;;  %v317_v8 = vld [vmem:[#allocation8 + $0x2b8] sm:$0xff] }
  0x27   :  { %v776_v16 = vsel %vm112_vm1, %v575_v11, %v111_v15  ;;  %v246_v11 = vld [vmem:[#allocation8 + $0x80] sm:$0xff]  ;;  %365 = vmatpush.msra.mxu1 %v280_v10  ;;  %v243_v10 = vld [vmem:[#allocation8 + $0x68] sm:$0xff] }
  0x29   :  { %366 = vmatpush.msra.mxu1 %v278_v12  ;;  %v315_v12 = vld [vmem:[#allocation8 + $0x2a8] sm:$0xff] }
  0x2b   :  { %367 = vmatpush.msra.mxu1 %v276_v14  ;;  %v304_v14 = vld [vmem:[#allocation8 + $0x250] sm:$0xff] }
  0x92   :  { %v106_v17 = vpop.xlane.xlu0 %105 }
  0x93   :  { %v114_v18 = vmul.f32 %v776_v16, %v106_v17  ;;  %v242_v17 = vld [vmem:[#allocation8 + $0x60] sm:$0xff] }
  0x95   :  { %v116_v19 = vperm.slane %v114_v18, 0  ;;  %v274_v18 = vld [vmem:[#allocation8 + $0x160] sm:$0xff] }
  0x96   :  { %368 = vmatpush.msra.mxu1 %v274_v18  ;;  %v313_v18 = vld [vmem:[#allocation8 + $0x298] sm:$0xff] }
  0x97   :  { %v118_v20 = vsub.f32 %v88_v1, %v116_v19  ;;  %v256_v1 = vld [vmem:[#allocation8 + $0xd0] sm:$0xff] }
  0x98   :  { %341 = vmatpush.msra.mxu0 %v256_v1  ;;  %v310_v1 = vld [vmem:[#allocation8 + $0x280] sm:$0xff] }
  0x99   :  { %v119_v21 = vmul.f32 %v118_v20, %v118_v20 }
  0x9a   :  { %342 = vmatpush.msra.mxu0 %v254_v3  ;;  %v287_v3 = vld [vmem:[#allocation8 + $0x1c8] sm:$0xff] }
  0x9b   :  { %v121_v22 = vperm.slane %v119_v21, 0  ;;  %v122_v23 = vperm.slane %v119_v21, 1  ;;  %v123_v24 = vperm.slane %v119_v21, 2  ;;  %v272_v21 = vld [vmem:[#allocation8 + $0x150] sm:$0xff] }
  0x9c   :  { %343 = vmatpush.msra.mxu0 %v252_v5  ;;  %369 = vmatpush.msra.mxu1 %v272_v21  ;;  %v308_v5 = vld [vmem:[#allocation8 + $0x270] sm:$0xff]  ;;  %v279_v21 = vld [vmem:[#allocation8 + $0x188] sm:$0xff] }
  0x9d   :  { %v127_v25 = vsel %vm99_vm0, %v121_v22, 0.0  ;;  %v128_v26 = vsel %vm99_vm0, %v122_v23, 0.0  ;;  %v130_v28 = vsel %vm99_vm0, %v123_v24, 0.0 }
  0x9e   :  { %v129_v27 = vadd.f32 %v128_v26, %v127_v25  ;;  %344 = vmatpush.msra.mxu0 %v250_v7  ;;  %v285_v7 = vld [vmem:[#allocation8 + $0x1b8] sm:$0xff] }
  0xa0   :  { %v131_v29 = vadd.f32 %v130_v28, %v129_v27  ;;  %345 = vmatpush.msra.mxu0 %v248_v9  ;;  %v306_v9 = vld [vmem:[#allocation8 + $0x260] sm:$0xff] }
  0xa2   :  { %132 = vadd.xlane.f32.xlu0 %v131_v29  ;;  %346 = vmatpush.msra.mxu0 %v246_v11  ;;  %v283_v11 = vld [vmem:[#allocation8 + $0x1a8] sm:$0xff] }
  0xa4   :  { %347 = vmatpush.msra.mxu0 %v244_v13  ;;  %v807_v13 = vld [vmem:[#allocation1 + $0x2] ss:$4 sm:$0xff] }
  0xa5   :  { %224 = vst [vmem:[#allocation1] sm:$0xff] %v782_v30  ;;  %v298_v30 = vld [vmem:[#allocation8 + $0x220] sm:$0xff] }
  0xa6   :  { %348 = vmatpush.msra.mxu0 %v242_v17  ;;  %v281_v17 = vld [vmem:[#allocation8 + $0x198] sm:$0xff]  ;;  %225 = vst [vmem:[#allocation1 + $0x8] sm:$0xff] %v784_v31  ;;  %v307_v31 = vld [vmem:[#allocation8 + $0x268] sm:$0xff] }
 0x115   :  { %v133_v33 = vpop.xlane.xlu0 %132 }
 0x116   :  { %v134_v34 = vmul.f32 %v133_v33, %v776_v16 }
 0x118   :  { %v135_v35 = vadd.f32 1e-05, %v134_v34 }
 0x11a   :  { %576 = vrsqrt.f32 %v135_v35  ;;  %vm142_vm4 = vweird.f32 %v135_v35 }
 0x120   :  { %v577_v36 = vpop.eup %576 }
 0x121   :  { %v137_v37 = vmul.f32 %v577_v36, %v135_v35  ;;  %vm143_vm2 = vweird.f32 %v577_v36  ;;  %v238_v35 = vld [vmem:[#allocation8 + $0x40] sm:$0xff] }
 0x122   :  { %vm144_vm5 = vmor %vm142_vm4, %vm143_vm2 }
 0x123   :  { %v138_v38 = vmul.f32 %v577_v36, %v137_v37  ;;  %v324_v37 = vld [vmem:[#allocation8 + $0x2f0] sm:$0xff] }
 0x124   :  { %379 = vmatpush.msra.mxu2 %v324_v37  ;;  %v231_v37 = vld [vmem:[#allocation8 + $0x8] sm:$0xff] }
 0x125   :  { %v139_v39 = vmul.f32 0.5, %v138_v38  ;;  %v261_v38 = vld [vmem:[#allocation8 + $0xf8] sm:$0xff] }
 0x126   :  { %399 = vmatpush.msra.mxu3 %v261_v38  ;;  %380 = vmatpush.msra.mxu2 %v322_v41  ;;  %v271_v38 = vld [vmem:[#allocation8 + $0x148] sm:$0xff] }
 0x127   :  { %v140_v43 = vsub.f32 1.5, %v139_v39  ;;  %v236_v39 = vld [vmem:[#allocation8 + $0x30] sm:$0xff] }
 0x128   :  { %400 = vmatpush.msra.mxu3 %v259_v42  ;;  %381 = vmatpush.msra.mxu2 %v320_v45  ;;  %v269_v42 = vld [vmem:[#allocation8 + $0x138] sm:$0xff] }
 0x129   :  { %v141_v44 = vmul.f32 %v577_v36, %v140_v43  ;;  %v234_v43 = vld [vmem:[#allocation8 + $0x20] sm:$0xff] }
 0x12a   :  { %401 = vmatpush.msra.mxu3 %v257_v46  ;;  %v299_v46 = vld [vmem:[#allocation8 + $0x228] sm:$0xff] }
 0x12b   :  { %v145_v47 = vsel %vm144_vm5, %v577_v36, %v141_v44  ;;  %v270_v36 = vld [vmem:[#allocation8 + $0x140] sm:$0xff] }
 0x12c   :  { %v147_v48 = vperm.slane %v145_v47, 0  ;;  %370 = vmatpush.msra.mxu1 %v270_v36  ;;  %v266_v44 = vld [vmem:[#allocation8 + $0x120] sm:$0xff]  ;;  %v232_v47 = vld [vmem:[#allocation8 + $0x10] sm:$0xff] }
 0x12d   :  { %v294_v36 = vld [vmem:[#allocation8 + $0x200] sm:$0xff] }
 0x12e   :  { %v149_v50 = vmul.f32 %v147_v48, %v118_v20  ;;  %v240_v20 = vld [vmem:[#allocation8 + $0x50] sm:$0xff]  ;;  %371 = vmatpush.msra.mxu1 %v268_v40 }
 0x12f   :  { %349 = vmatpush.msra.mxu0 %v240_v20  ;;  %v264_v48 = vld [vmem:[#allocation8 + $0x110] sm:$0xff]  ;;  %v239_v20 = vld [vmem:[#allocation8 + $0x48] sm:$0xff] }
 0x130   :  { %v161_v51 = vmul.f32 %v159_v49, %v149_v50  ;;  %372 = vmatpush.msra.mxu1 %v266_v44  ;;  %v318_v49 = vld [vmem:[#allocation8 + $0x2c0] sm:$0xff]  ;;  %v255_v50 = vld [vmem:[#allocation8 + $0xc8] sm:$0xff] }
 0x131   :  { %350 = vmatpush.msra.mxu0 %v238_v35  ;;  %382 = vmatpush.msra.mxu2 %v318_v49  ;;  %v305_v35 = vld [vmem:[#allocation8 + $0x258] sm:$0xff]  ;;  %v267_v44 = vld [vmem:[#allocation8 + $0x128] sm:$0xff] }
 0x132   :  { %v167_v52 = vadd.f32 %v165_v32, %v161_v51  ;;  %373 = vmatpush.msra.mxu1 %v264_v48  ;;  %402 = vmatpush.msra.mxu3 %v255_v50  ;;  %v230_v51 = vld [vmem:[#allocation8] sm:$0xff]  ;;  %v297_v48 = vld [vmem:[#allocation8 + $0x218] sm:$0xff]  ;;  %v263_v49 = vld [vmem:[#allocation8 + $0x108] sm:$0xff] }
 0x133   :  { %351 = vmatpush.msra.mxu0 %v236_v39  ;;  %v303_v39 = vld [vmem:[#allocation8 + $0x248] sm:$0xff] }
 0x134   :  { %v169_v53 = vperm.slane %v167_v52, 0  ;;  %v170_v54 = vperm.slane %v167_v52, 1  ;;  %v171_v55 = vperm.slane %v167_v52, 2  ;;  %v295_v50 = vld [vmem:[#allocation8 + $0x208] sm:$0xff] }
 0x135   :  { %352 = vmatpush.msra.mxu0 %v234_v43  ;;  %v301_v43 = vld [vmem:[#allocation8 + $0x238] sm:$0xff] }
 0x136   :  { %v175_v56 = vsel %vm99_vm0, %v169_v53, 0.0  ;;  %v176_v57 = vsel %vm99_vm0, %v170_v54, 0.0  ;;  %v178_v59 = vsel %vm99_vm0, %v171_v55, 0.0  ;;  %v316_v53 = vld [vmem:[#allocation8 + $0x2b0] sm:$0xff]  ;;  %v253_v54 = vld [vmem:[#allocation8 + $0xb8] sm:$0xff] }
 0x137   :  { %v177_v58 = vadd.f32 %v176_v57, %v175_v56  ;;  %353 = vmatpush.msra.mxu0 %v232_v47  ;;  %v293_v55 = vld [vmem:[#allocation8 + $0x1f8] sm:$0xff]  ;;  %383 = vmatpush.msra.mxu2 %v316_v53  ;;  %v314_v57 = vld [vmem:[#allocation8 + $0x2a0] sm:$0xff]  ;;  %v491_v53 = vld [vmem:[#allocation9 + $0xf0] sm:$0xff] }
 0x138   :  { %403 = vmatpush.msra.mxu3 %v253_v54  ;;  %v325_v56 = vld [vmem:[#allocation8 + $0x2f8] sm:$0xff] }
 0x139   :  { %v179_v60 = vadd.f32 %v178_v59, %v177_v58  ;;  %354 = vmatpush.msra.mxu0 %v230_v51  ;;  %v251_v58 = vld [vmem:[#allocation8 + $0xa8] sm:$0xff]  ;;  %384 = vmatpush.msra.mxu2 %v314_v57  ;;  %v265_v47 = vld [vmem:[#allocation8 + $0x118] sm:$0xff]  ;;  %v475_v51 = vld [vmem:[#allocation9 + $0x70] sm:$0xff] }
 0x13a   :  { %v291_v59 = vld [vmem:[#allocation8 + $0x1e8] sm:$0xff]  ;;  %404 = vmatpush.msra.mxu3 %v251_v58  ;;  %v473_v58 = vld [vmem:[#allocation9 + $0x60] sm:$0xff] }
 0x13b   :  { %180 = vadd.xlane.f32.xlu1 %v179_v60  ;;  %419 = vmatpush.msrb.mxu0 %v293_v55  ;;  %v323_v60 = vld [vmem:[#allocation8 + $0x2e8] sm:$0xff] }
 0x13c   :  { %385 = vmatpush.msra.mxu2 %v312_v61  ;;  %405 = vmatpush.msra.mxu3 %v249_v62  ;;  %v474_v55 = vld [vmem:[#allocation9 + $0x68] sm:$0xff]  ;;  %v472_v61 = vld [vmem:[#allocation9 + $0x58] sm:$0xff] }
 0x13d   :  { %420 = vmatpush.msrb.mxu0 %v291_v59  ;;  %v490_v57 = vld [vmem:[#allocation9 + $0xe8] sm:$0xff] }
 0x13e   :  { %386 = vmatpush.msra.mxu2 %v310_v1  ;;  %406 = vmatpush.msra.mxu3 %v247_v2  ;;  %v487_v2 = vld [vmem:[#allocation9 + $0xd0] sm:$0xff] }
 0x13f   :  { %421 = vmatpush.msrb.mxu0 %v289_v63  ;;  %v488_v63 = vld [vmem:[#allocation9 + $0xd8] sm:$0xff] }
 0x140   :  { %387 = vmatpush.msra.mxu2 %v308_v5  ;;  %407 = vmatpush.msra.mxu3 %v245_v6  ;;  %v486_v5 = vld [vmem:[#allocation9 + $0xc8] sm:$0xff]  ;;  %v469_v6 = vld [vmem:[#allocation9 + $0x40] sm:$0xff] }
 0x141   :  { %422 = vmatpush.msrb.mxu0 %v287_v3  ;;  %v470_v3 = vld [vmem:[#allocation9 + $0x48] sm:$0xff] }
 0x142   :  { %388 = vmatpush.msra.mxu2 %v306_v9  ;;  %408 = vmatpush.msra.mxu3 %v243_v10  ;;  %v468_v10 = vld [vmem:[#allocation9 + $0x38] sm:$0xff] }
 0x143   :  { %423 = vmatpush.msrb.mxu0 %v285_v7 }
 0x144   :  { %389 = vmatpush.msra.mxu2 %v304_v14  ;;  %v227_v14 = vld [vmem:[#allocation1 + $0x3] ss:$4 sm:$0xff] }
 0x145   :  { %424 = vmatpush.msrb.mxu0 %v283_v11 }
 0x147   :  { %425 = vmatpush.msrb.mxu0 %v281_v17 }
 0x149   :  { %426 = vmatpush.msrb.mxu0 %v279_v21  ;;  %v466_v21 = vld [vmem:[#allocation9 + $0x28] sm:$0xff] }
 0x1ae   :  { %v181_v15 = vpop.xlane.xlu1 %180 }
 0x1af   :  { %v182_v19 = vmul.f32 %v181_v15, %v776_v16  ;;  %v241_v15 = vld [vmem:[#allocation8 + $0x58] sm:$0xff] }
 0x1b0   :  { %409 = vmatpush.msra.mxu3 %v241_v15 }
 0x1b1   :  { %v184_v22 = vperm.slane %v182_v19, 0  ;;  %v302_v19 = vld [vmem:[#allocation8 + $0x240] sm:$0xff] }
 0x1b2   :  { %390 = vmatpush.msra.mxu2 %v302_v19  ;;  %410 = vmatpush.msra.mxu3 %v239_v20 }
 0x1b3   :  { %v800_v23 = vsub.f32 %v167_v52, %v184_v22  ;;  %v262_v52 = vld [vmem:[#allocation8 + $0x100] sm:$0xff]  ;;  %v311_v22 = vld [vmem:[#allocation8 + $0x288] sm:$0xff] }
 0x1b4   :  { %374 = vmatpush.msra.mxu1 %v262_v52  ;;  %v492_v52 = vld [vmem:[#allocation9 + $0xf8] sm:$0xff] }
 0x1b5   :  { %v187_v24 = vmul.f32 %v800_v23, %v800_v23 }
 0x1b6   :  { %439 = vmatpush.msrb.mxu1 %v325_v56 }
 0x1b7   :  { %v189_v25 = vperm.slane %v187_v24, 0  ;;  %v190_v26 = vperm.slane %v187_v24, 1  ;;  %v191_v27 = vperm.slane %v187_v24, 2  ;;  %v300_v24 = vld [vmem:[#allocation8 + $0x230] sm:$0xff] }
 0x1b8   :  { %440 = vmatpush.msrb.mxu1 %v323_v60  ;;  %391 = vmatpush.msra.mxu2 %v300_v24  ;;  %v489_v60 = vld [vmem:[#allocation9 + $0xe0] sm:$0xff]  ;;  %v483_v24 = vld [vmem:[#allocation9 + $0xb0] sm:$0xff] }
 0x1b9   :  { %v195_v28 = vsel %vm99_vm0, %v189_v25, 0.0  ;;  %v196_v29 = vsel %vm99_vm0, %v190_v26, 0.0  ;;  %v198_v33 = vsel %vm99_vm0, %v191_v27, 0.0  ;;  %v237_v25 = vld [vmem:[#allocation8 + $0x38] sm:$0xff] }
 0x1ba   :  { %v197_v32 = vadd.f32 %v196_v29, %v195_v28  ;;  %441 = vmatpush.msrb.mxu1 %v321_v0  ;;  %v277_v26 = vld [vmem:[#allocation8 + $0x178] sm:$0xff]  ;;  %411 = vmatpush.msra.mxu3 %v237_v25  ;;  %v235_v28 = vld [vmem:[#allocation8 + $0x28] sm:$0xff]  ;;  %v471_v0 = vld [vmem:[#allocation9 + $0x50] sm:$0xff] }
 0x1bb   :  { %v309_v27 = vld [vmem:[#allocation8 + $0x278] sm:$0xff]  ;;  %v275_v29 = vld [vmem:[#allocation8 + $0x168] sm:$0xff]  ;;  %427 = vmatpush.msrb.mxu0 %v277_v26  ;;  %392 = vmatpush.msra.mxu2 %v298_v30  ;;  %v463_v26 = vld [vmem:[#allocation9 + $0x10] sm:$0xff] }
 0x1bc   :  { %v199_v34 = vadd.f32 %v198_v33, %v197_v32  ;;  %442 = vmatpush.msrb.mxu1 %v319_v4  ;;  %v296_v32 = vld [vmem:[#allocation8 + $0x210] sm:$0xff]  ;;  %v233_v33 = vld [vmem:[#allocation8 + $0x18] sm:$0xff]  ;;  %412 = vmatpush.msra.mxu3 %v235_v28  ;;  %v482_v25 = vld [vmem:[#allocation9 + $0xa8] sm:$0xff] }
 0x1bd   :  { %428 = vmatpush.msrb.mxu0 %v275_v29  ;;  %393 = vmatpush.msra.mxu2 %v296_v32  ;;  %v462_v30 = vld [vmem:[#allocation9 + $0x8] sm:$0xff]  ;;  %v480_v28 = vld [vmem:[#allocation9 + $0x98] sm:$0xff]  ;;  %v461_v29 = vld [vmem:[#allocation9] sm:$0xff] }
 0x1be   :  { %200 = vadd.xlane.f32.xlu1 %v199_v34  ;;  %443 = vmatpush.msrb.mxu1 %v317_v8  ;;  %v273_v34 = vld [vmem:[#allocation8 + $0x158] sm:$0xff]  ;;  %v485_v8 = vld [vmem:[#allocation9 + $0xc0] sm:$0xff]  ;;  %v478_v32 = vld [vmem:[#allocation9 + $0x88] sm:$0xff] }
 0x1bf   :  { %413 = vmatpush.msra.mxu3 %v233_v33  ;;  %429 = vmatpush.msrb.mxu0 %v273_v34  ;;  %v477_v33 = vld [vmem:[#allocation9 + $0x80] sm:$0xff] }
 0x1c0   :  { %444 = vmatpush.msrb.mxu1 %v315_v12  ;;  %394 = vmatpush.msra.mxu2 %v294_v36  ;;  %v467_v12 = vld [vmem:[#allocation9 + $0x30] sm:$0xff]  ;;  %v326_v34 = vld [vmem:[%s827_s3] sm:$0x3] }
 0x1c1   :  { %414 = vmatpush.msra.mxu3 %v231_v37  ;;  %430 = vmatpush.msrb.mxu0 %v271_v38 }
 0x1c2   :  { %445 = vmatpush.msrb.mxu1 %v313_v18 }
 0x1c3   :  { %431 = vmatpush.msrb.mxu0 %v269_v42  ;;  %513 = vmatpush.msrb.mxu3 %v492_v52 }
 0x1c4   :  { %446 = vmatpush.msrb.mxu1 %v311_v22  ;;  %v484_v22 = vld [vmem:[#allocation9 + $0xb8] sm:$0xff] }
 0x1c5   :  { %432 = vmatpush.msrb.mxu0 %v267_v44  ;;  %514 = vmatpush.msrb.mxu3 %v491_v53 }
 0x1c6   :  { %447 = vmatpush.msrb.mxu1 %v309_v27  ;;  %v481_v27 = vld [vmem:[#allocation9 + $0xa0] sm:$0xff] }
 0x1c7   :  { %433 = vmatpush.msrb.mxu0 %v265_v47  ;;  %515 = vmatpush.msrb.mxu3 %v490_v57 }
 0x1c8   :  { %448 = vmatpush.msrb.mxu1 %v307_v31  ;;  %v479_v31 = vld [vmem:[#allocation9 + $0x90] sm:$0xff] }
 0x1c9   :  { %434 = vmatpush.msrb.mxu0 %v263_v49  ;;  %516 = vmatpush.msrb.mxu3 %v489_v60 }
 0x1ca   :  { %449 = vmatpush.msrb.mxu1 %v305_v35  ;;  %v335_v35 = vperm.slane %v326_v34, 0 }
 0x1cb   :  { %517 = vmatpush.msrb.mxu3 %v488_v63 }
 0x1cc   :  { %450 = vmatpush.msrb.mxu1 %v303_v39  ;;  %v336_v39 = vperm.slane %v326_v34, 1 }
 0x1cd   :  { %518 = vmatpush.msrb.mxu3 %v487_v2 }
 0x1ce   :  { %451 = vmatpush.msrb.mxu1 %v301_v43 }
 0x1cf   :  { %519 = vmatpush.msrb.mxu3 %v486_v5 }
 0x1d0   :  { %452 = vmatpush.msrb.mxu1 %v299_v46 }
 0x1d1   :  { %520 = vmatpush.msrb.mxu3 %v485_v8 }
 0x1d2   :  { %453 = vmatpush.msrb.mxu1 %v297_v48 }
 0x1d3   :  { %521 = vmatpush.msrb.mxu3 %v484_v22 }
 0x1d4   :  { %454 = vmatpush.msrb.mxu1 %v295_v50 }
 0x1d5   :  { %522 = vmatpush.msrb.mxu3 %v483_v24 }
 0x1d7   :  { %523 = vmatpush.msrb.mxu3 %v482_v25 }
 0x1d9   :  { %524 = vmatpush.msrb.mxu3 %v481_v27 }
 0x1db   :  { %525 = vmatpush.msrb.mxu3 %v480_v28 }
 0x1dd   :  { %526 = vmatpush.msrb.mxu3 %v479_v31 }
 0x1df   :  { %527 = vmatpush.msrb.mxu3 %v478_v32 }
 0x1e1   :  { %528 = vmatpush.msrb.mxu3 %v477_v33 }
 0x231   :  { %v201_v40 = vpop.xlane.xlu1 %200 }
 0x232   :  { %v202_v41 = vmul.f32 %v201_v40, %v776_v16  ;;  %v476_v16 = vld [vmem:[#allocation9 + $0x78] sm:$0xff] }
 0x233   :  { %493 = vmatpush.msrb.mxu2 %v476_v16  ;;  %v91_v16 = vld [vmem:[%s829_s5] sm:$0x3] }
 0x234   :  { %v203_v45 = vadd.f32 1e-05, %v202_v41 }
 0x235   :  { %494 = vmatpush.msrb.mxu2 %v475_v51 }
 0x236   :  { %578 = vrsqrt.f32 %v203_v45  ;;  %vm210_vm8 = vweird.f32 %v203_v45 }
 0x237   :  { %495 = vmatpush.msrb.mxu2 %v474_v55 }
 0x239   :  { %496 = vmatpush.msrb.mxu2 %v473_v58 }
 0x23b   :  { %497 = vmatpush.msrb.mxu2 %v472_v61 }
 0x23c   :  { %v579_v54 = vpop.eup %578 }
 0x23d   :  { %v205_v56 = vmul.f32 %v579_v54, %v203_v45  ;;  %vm211_vm7 = vweird.f32 %v579_v54  ;;  %498 = vmatpush.msrb.mxu2 %v471_v0 }
 0x23e   :  { %vm212_vm9 = vmor %vm210_vm8, %vm211_vm7 }
 0x23f   :  { %v206_v59 = vmul.f32 %v579_v54, %v205_v56  ;;  %499 = vmatpush.msrb.mxu2 %v470_v3 }
 0x241   :  { %v207_v62 = vmul.f32 0.5, %v206_v59  ;;  %500 = vmatpush.msrb.mxu2 %v469_v6  ;;  %v541_v59 = vld [vmem:[#allocation2] sm:$0x1] }
 0x243   :  { %v208_v1 = vsub.f32 1.5, %v207_v62  ;;  %501 = vmatpush.msrb.mxu2 %v468_v10 }
 0x245   :  { %v209_v4 = vmul.f32 %v579_v54, %v208_v1  ;;  %502 = vmatpush.msrb.mxu2 %v467_v12 }
 0x247   :  { %v213_v7 = vsel %vm212_vm9, %v579_v54, %v209_v4  ;;  %503 = vmatpush.msrb.mxu2 %v466_v21  ;;  %v535_v54 = vrot.slane %v91_v16, 1 }
 0x248   :  { %v215_v9 = vperm.slane %v213_v7, 0 }
 0x24a   :  { %v217_v11 = vmul.f32 %v215_v9, %v800_v23  ;;  %v465_v23 = vld [vmem:[#allocation9 + $0x20] sm:$0xff] }
 0x24b   :  { %504 = vmatpush.msrb.mxu2 %v465_v23 }
 0x24c   :  { %v223_v15 = vmul.f32 %v807_v13, %v217_v11  ;;  %v464_v13 = vld [vmem:[#allocation9 + $0x18] sm:$0xff] }
 0x24d   :  { %505 = vmatpush.msrb.mxu2 %v464_v13 }
 0x24e   :  { %v229_v17 = vadd.f32 %v227_v14, %v223_v15 }
 0x24f   :  { %506 = vmatpush.msrb.mxu2 %v463_v26 }
 0x250   :  { %v328_v18 = vperm.slane %v229_v17, 0  ;;  %v329_v19 = vperm.slane %v229_v17, 1  ;;  %v330_v20 = vperm.slane %v229_v17, 2 }
 0x251   :  { %507 = vmatpush.msrb.mxu2 %v462_v30 }
 0x252   :  { %355 = vmatmul.f32.vlgmr.msra.gmra.mxu0 %v328_v18  ;;  %375 = vmatmul.f32.vlgmr.msra.gmra.mxu1 %v329_v19 }
 0x253   :  { %395 = vmatmul.f32.vlgmr.msra.gmra.mxu2 %v330_v20  ;;  %415 = vmatmul.f32.vlgmr.msra.gmra.mxu3 %v328_v18 }
 0x254   :  { %508 = vmatpush.msrb.mxu2 %v461_v29 }
 0x25a   :  { %435 = vmatmul.f32.vlgmr.msrb.gmra.mxu0 %v329_v19  ;;  %455 = vmatmul.f32.vlgmr.msrb.gmra.mxu1 %v330_v20 }
 0x2cf   :  { %v356_v36 = vpop.f32.mrf.mxu0  ;;  %v376_v37 = vpop.f32.mrf.mxu1 }
 0x2d0   :  { %v357_v38 = vadd.f32 %v356_v36, %v335_v35 }
 0x2d2   :  { %v377_v40 = vadd.f32 %v376_v37, %v357_v38 }
 0x2d6   :  { %v396_v41 = vpop.f32.mrf.mxu2  ;;  %v416_v42 = vpop.f32.mrf.mxu3 }
 0x2d7   :  { %v397_v43 = vadd.f32 %v396_v41, %v377_v40  ;;  %v417_v44 = vadd.f32 %v416_v42, %v336_v39  ;;  %v436_v45 = vpop.f32.mrf.mxu0  ;;  %v456_v48 = vpop.f32.mrf.mxu1 }
 0x2d9   :  { %v459_v46 = vmax.f32 %v397_v43, 0.0  ;;  %v437_v47 = vadd.f32 %v436_v45, %v417_v44 }
 0x2db   :  { %v457_v49 = vadd.f32 %v456_v48, %v437_v47  ;;  %509 = vmatmul.f32.vlgmr.msrb.gmra.mxu2 %v459_v46 }
 0x2dd   :  { %v460_v50 = vmax.f32 %v457_v49, 0.0 }
 0x2df   :  { %529 = vmatmul.f32.vlgmr.msrb.gmra.mxu3 %v460_v50 }
 0x35e   :  { %v510_v51 = vpop.f32.mrf.mxu2 }
 0x35f   :  { %v511_v52 = vadd.f32 %v510_v51, %v91_v16 }
 0x362   :  { %v530_v53 = vpop.f32.mrf.mxu3 }
 0x363   :  { %v531_v55 = vadd.f32 %v530_v53, %v511_v52 }
 0x365   :  { %v533_v56 = vmax.f32 %v531_v55, 0.0 }
 0x367   :  { %v537_v57 = vmul.f32 %v535_v54, %v533_v56 }
 0x369   :  { %v538_v58 = vsel %vm99_vm0, %v537_v57, 0.0 }
 0x36a   :  { %539 = vadd.xlane.f32.xlu2 %v538_v58 }
 0x3dd   :  { %v540_v60 = vpop.xlane.xlu2 %539 }
 0x3de   :  { %v542_v61 = vadd.f32 %v541_v59, %v540_v60 }
 0x3e0   :  { %544 = vst.msk [vmem:[#allocation11] sm:$0x1] %vm543_vm10, %v542_v61 }
 0x3e1   :  { %555 = dma.vmem_to_hbm [thread:$0]  %s551_s26, 16, %s553_s29, [#allocation5]  }
 0x3e2   :  { %706 = dma.done.wait [#allocation5], 16  }
 0x3e3   :  { %707 = vsyncadd [#allocation5], 4294967280 }
 0x3e4   :  { %560 = vsyncpa [#allocation4], 1 }
 0x3e5   :  { %561 = vsyncpa [#allocation7], 1 }
 0x3e6   :  { %562 = vsyncpa [#allocation10], 1 }
 0x3e7   :  { %563 = vsyncpa [#allocation5], 1 }

</bundles_post_ra>
